<compile_context>
chip_gen: v6e
topology: v6e:2x2x1
jax: 0.10.0
libtpu: 0.0.40
codegen_flags: <defaults>
</compile_context>

<pallas_src>
import jax
import jax.numpy as jnp
from jax.experimental import pallas as pl
from jax.experimental.pallas import tpu as pltpu

LANE = 128  # lane width; last dim of the 2D slab the kernel operates on


def _make_eif_kernel(inv_tau, rest_potential, exp_term, threshold, out_dtype):
    """Elementwise: spike = ((1/tau) * (x + rest + delta_T*exp(-theta_rh/delta_T)) >= thr).

    All scalar parameters are folded into Python-float compile-time constants
    (no SMEM params ref, no per-step div/exp).  The in-kernel work is a single
    fused mul/add + compare per vreg, kept in the exact same arithmetic order
    as the PyTorch forward so the result is bit-identical.
    Assumes the usual tau > 0 (same implicit assumption as 1/tau in PyTorch).
    """
    def kernel(x_ref, o_ref):
        x = x_ref[...].astype(jnp.float32)          # cast in-vreg, not in HBM
        mem = inv_tau * (x + rest_potential + exp_term)
        o_ref[...] = (mem >= threshold).astype(out_dtype)
    return kernel


def multistep_eif_forward(x, threshold=1.0, rest_potential=0.0, tau=1.0,
                          delta_T=1.0, theta_rh=0.8, block_rows=1024):
    """EIF spike generation. Returns float32 spikes with the same shape as x.

    x is kept in its native dtype in HBM (no host-side upcast copy); the only
    host-side data movement beyond the kernel itself is an optional pad of the
    sub-128 lane tail (a no-op when x.size % 128 == 0, as in typical NCHW
    activations).
    """
    # --- fold scalar parameters (computed once, in float32, mirroring the
    #     PyTorch arithmetic order so results are bit-exact) ------------------
    arg = (jnp.float32(0.0) - jnp.float32(theta_rh)) / jnp.float32(delta_T)
    exp_term = float(jnp.float32(delta_T) * jnp.exp(arg))   # delta_T * exp((0-theta_rh)/delta_T)
    inv_tau = 1.0 / float(tau)
    rest = float(rest_potential)
    thr = float(threshold)

    # --- flatten to a lane-dense (rows, 128) slab ---------------------------
    orig_shape = x.shape
    flat = x.reshape(-1)                    # native dtype, no astype copy
    n = flat.shape[0]
    pad = (-n) % LANE
    if pad:                                 # only the sub-128 tail, if any
        flat = jnp.pad(flat, (0, pad))
    rows = (n + pad) // LANE
    x2d = flat.reshape(rows, LANE)

    # Block: up to `block_rows` x 128 (512 KiB for f32 at 1024 rows; ~2 MiB
    # with double-buffered in+out — fits the default scoped VMEM on v5e/v6e/v7x).
    # If the array is smaller than one block, use the full extent (allowed by
    # the (8,128) rule since it equals the array dim). Ragged last blocks are
    # handled by Pallas masked writes — no spurious spikes, no output slice.
    br = block_rows if rows > block_rows else rows
    grid = (pl.cdiv(rows, br),)

    kernel = _make_eif_kernel(inv_tau, rest, exp_term, thr, jnp.float32)

    out2d = pl.pallas_call(
        kernel,
        out_shape=jax.ShapeDtypeStruct((rows, LANE), jnp.float32),
        grid=grid,
        in_specs=[pl.BlockSpec((br, LANE), lambda i: (i, 0))],
        out_specs=pl.BlockSpec((br, LANE), lambda i: (i, 0)),
        compiler_params=pltpu.CompilerParams(
            dimension_semantics=("parallel",)),   # lets v7x shard the grid over 2 TCs
    )(x2d)

    spikes = out2d.reshape(-1)
    if pad:
        spikes = spikes[:n]
    return spikes.reshape(orig_shape)


def _reference(x, threshold, rest_potential, tau, delta_T, theta_rh):
    """Faithful port of MultiStepEIFNode.forward (mem re-zeroed each call)."""
    mem0 = jnp.zeros_like(x)
    mem = mem0 + 1.0 / tau * (x - (mem0 - rest_potential)
                              + delta_T * jnp.exp((mem0 - theta_rh) / delta_T))
    return (mem >= threshold).astype(jnp.float32)


if __name__ == "__main__":
    key = jax.random.PRNGKey(0)
    # NCHW input, small shapes
    x = jax.random.normal(key, (2, 4, 16, 16), dtype=jnp.float32)

    # Deterministic parameters: the PyTorch module's defaults.
    threshold, rest_potential, tau, delta_T, theta_rh = 1.0, 0.0, 1.0, 1.0, 0.8

    spikes = multistep_eif_forward(x, threshold, rest_potential, tau,
                                   delta_T, theta_rh)
    spikes = jax.block_until_ready(spikes)

    ref = _reference(x, threshold, rest_potential, tau, delta_T, theta_rh)
    assert spikes.shape == x.shape
    assert spikes.dtype == jnp.float32
    assert jnp.array_equal(spikes, ref), "mismatch vs reference"

    print("KERNEL_OK")
</pallas_src>

<mosaic_0001>
module attributes {stable_mosaic.version = 11 : i64} {
  func.func @kernel(%arg0: i32, %arg1: memref<16x128xf32, #tpu.memory_space<vmem>>, %arg2: memref<16x128xf32, #tpu.memory_space<vmem>>) attributes {dimension_semantics = [#tpu.dimension_semantics<parallel>], iteration_bounds = array<i64: 1>, scalar_prefetch = 0 : i64, scratch_operands = 0 : i64, tpu.core_type = #tpu.core_type<tc>, window_params = [{transform_indices = @transform_0, window_bounds = array<i64: 16, 128>}, {transform_indices = @transform_1, window_bounds = array<i64: 16, 128>}]} {
    %c0 = arith.constant 0 : index
    %c0_0 = arith.constant 0 : index
    %0 = vector.load %arg1[%c0, %c0_0] : memref<16x128xf32, #tpu.memory_space<vmem>>, vector<16x128xf32>
    %cst = arith.constant 0.000000e+00 : f32
    %1 = vector.broadcast %cst : f32 to vector<16x128xf32>
    %2 = arith.addf %0, %1 : vector<16x128xf32>
    %cst_1 = arith.constant 0.449328959 : f32
    %3 = vector.broadcast %cst_1 : f32 to vector<16x128xf32>
    %4 = arith.addf %2, %3 : vector<16x128xf32>
    %cst_2 = arith.constant 1.000000e+00 : f32
    %5 = vector.broadcast %cst_2 : f32 to vector<16x128xf32>
    %6 = arith.mulf %5, %4 : vector<16x128xf32>
    %cst_3 = arith.constant 1.000000e+00 : f32
    %7 = vector.broadcast %cst_3 : f32 to vector<16x128xf32>
    %8 = arith.cmpf oge, %6, %7 : vector<16x128xf32>
    %9 = arith.extui %8 : vector<16x128xi1> to vector<16x128xi32>
    %10 = arith.sitofp %9 : vector<16x128xi32> to vector<16x128xf32>
    %c0_4 = arith.constant 0 : index
    %c0_5 = arith.constant 0 : index
    %11 = vector.load %arg2[%c0_4, %c0_5] : memref<16x128xf32, #tpu.memory_space<vmem>>, vector<16x128xf32>
    tpu.vector_store %arg2[%c0_4, %c0_5], %10 {strides = array<i32>} : memref<16x128xf32, #tpu.memory_space<vmem>>, vector<16x128xf32>,
    return
  }
  func.func @transform_0(%arg0: i32) -> (i32, i32) {
    %c0_i32 = arith.constant 0 : i32
    %c0_i32_0 = arith.constant 0 : i32
    return %arg0, %c0_i32 : i32, i32
  }
  func.func @transform_1(%arg0: i32) -> (i32, i32) {
    %c0_i32 = arith.constant 0 : i32
    %c0_i32_0 = arith.constant 0 : i32
    return %arg0, %c0_i32 : i32, i32
  }
}

</mosaic_0001>

<bundles_post_ra>
// kernel: tpu_custom_call.1
= control target key start
LH: loop header
LB: loop body
LE: loop exit
PB: predicated region body
PF: predicated region fallthrough
CT: control target
= control target key end

     0   :  { %6 = vsyncpa [#allocation3], 0  ;;  %s126_s0 = inlined_call_operand.hbm [shape: f32[16,128], index: 0, kind: input, shape index: {}]   ;;  %s127_s1 = inlined_call_operand.hbm [shape: f32[16,128], index: 1, kind: output, shape index: {}]  }
   0x1   :  { %7 = vsyncpa [#allocation4], 0  ;;  %s105_s6 = smov [#allocation2]  }
   0x2   :  { %s13_s7 = sshll.u32 %s105_s6, 4  ;;  %s14_s7 = int_to_ptr.vmem [resolvable:$true] %s13_s7 }
   0x3   :  { %s69_s8 = scalar_lea.vmem %s14_s7, 256  ;;  %p74_p1 = scmp.lt.s32.totalorder %s14_s7, %s14_s7 }
   0x4   :  { %p70_p0 = scmp.ne.s32.totalorder %s14_s7, %s69_s8  ;;  %p75_p2 = scmp.lt.s32.totalorder %s69_s8, %s69_s8 }
   0x6   :  { %p76_p3 = por %p75_p2, %p74_p1 }
   0x8   :  { %p77_p4 = pnand %p76_p3, %p70_p0 }
   0xa   :  { %80 = shalt.err (!%p77_p4)
}
   0xb   :  { %s106_s9 = smov 128   ;;  %s107_s10 = smov 8  }
   0xc   :  { %19 = dma.hbm_to_vmem [thread:$0]  %s126_s0, 256, %s14_s7, [#allocation3], %s106_s9, %s106_s9, %s107_s10  }
   0xd   :  { %101 = dma.done.wait [#allocation3], 256  }
   0xe   :  { %102 = vsyncadd [#allocation3], 4294967040  ;;  %v23_v0 = vld [vmem:[#allocation2] sm:$0xff]  ;;  %v24_v1 = vld [vmem:[#allocation2 + $0x8] sm:$0xff]  ;;  %s108_s13 = smov [#allocation5]   ;;  %v109_v4 = vmov 0.0  }
   0xf   :  { %s42_s14 = sshll.u32 %s108_s13, 4  ;;  %v27_v2 = vadd.f32 0.44932896, %v23_v0  ;;  %v28_v3 = vadd.f32 0.44932896, %v24_v1  ;;  %s43_s14 = int_to_ptr.vmem [resolvable:$true] %s42_s14 }
  0x10   :  { %s81_s15 = scalar_lea.vmem %s43_s14, 256  ;;  %p86_p6 = scmp.lt.s32.totalorder %s43_s14, %s43_s14 }
  0x11   :  { %vm29_vm0 = vcmp.ge.f32.partialorder %v27_v2, 1.0  ;;  %vm30_vm1 = vcmp.ge.f32.partialorder %v28_v3, 1.0  ;;  %p82_p5 = scmp.ne.s32.totalorder %s43_s14, %s81_s15  ;;  %p87_p7 = scmp.lt.s32.totalorder %s81_s15, %s81_s15 }
  0x12   :  { %v54_v5 = vsel %vm29_vm0, 1.0, %v109_v4  ;;  %v55_v6 = vsel %vm30_vm1, 1.0, %v109_v4 }
  0x13   :  { %35 = vst [vmem:[#allocation5] sm:$0xff] %v54_v5  ;;  %36 = vst [vmem:[#allocation5 + $0x8] sm:$0xff] %v55_v6  ;;  %p88_p8 = por %p87_p7, %p86_p6 }
  0x15   :  { %p89_p9 = pnand %p88_p8, %p82_p5 }
  0x17   :  { %92 = shalt.err (!%p89_p9)
}
  0x18   :  { %48 = dma.vmem_to_hbm [thread:$0]  %s43_s14, 256, %s127_s1, [#allocation4], %s106_s9, %s106_s9, %s107_s10  }
  0x19   :  { %103 = dma.done.wait [#allocation4], 256  }
  0x1a   :  { %104 = vsyncadd [#allocation4], 4294967040 }
  0x1b   :  { %52 = vsyncpa [#allocation3], 1 }
  0x1c   :  { %53 = vsyncpa [#allocation4], 1 }

</bundles_post_ra>
